<compile_context>
chip_gen: v6e
topology: v6e:2x2x1
jax: 0.10.0
libtpu: 0.0.40
codegen_flags: <defaults>
</compile_context>

<pallas_src>
import functools

import numpy as np
import jax
import jax.numpy as jnp
from jax import lax
from jax.experimental import pallas as pl
from jax.experimental.pallas import tpu as pltpu

_LANES = 128  # polygons batched per block (lane width)


# ----------------------------------------------------------------------------
# Pallas kernel
# ----------------------------------------------------------------------------
def _cons_loss_kernel(n_edges, rows_per_tile, coef_ref, s_ref, out_ref):
    # coef_ref : (3E, 128)      f32  VMEM - per-edge line coeffs, polygons on lanes
    # s_ref    : (Tr, R2, Wp)   bf16 VMEM - per image row the stacked hi/lo rows of
    #                                       [pred*g, pred^2*g, g]
    # out_ref  : (R2, 128)      f32       - per-polygon sums, resident accumulator
    jr = pl.program_id(1)  # row-tile index (reduction axis)

    @pl.when(jr == 0)
    def _():
        out_ref[...] = jnp.zeros_like(out_ref)

    wp = s_ref.shape[2]
    # column coordinate, hoisted out of the per-row loop (pixels on sublanes).
    col = lax.broadcasted_iota(jnp.int32, (wp, 1), 0).astype(jnp.float32)
    coef = coef_ref[...]                                    # (3E, 128)
    base_row = jr * rows_per_tile

    def body(t, acc):
        r = (base_row + t).astype(jnp.float32)              # image-row coordinate
        s_r = s_ref[t]                                      # (R2, Wp) bf16
        vis = None
        for e in range(n_edges):                            # static unroll over edges
            a = coef[3 * e + 0:3 * e + 1, :]                # (1, 128)
            b = coef[3 * e + 1:3 * e + 2, :]
            c = coef[3 * e + 2:3 * e + 3, :]
            area = col * a + (b * r + c)                    # (Wp, 128)
            # keep iff area >= 0, and for even edges also |area| >= 1e-5
            thr = 1e-5 if (e % 2 == 0) else 0.0
            cond = area >= thr
            vis = cond if vis is None else jnp.logical_and(vis, cond)
        mask = jnp.where(vis, 1.0, 0.0).astype(jnp.bfloat16)  # (Wp, 128)
        # MXU: all per-polygon sums (s1, s2, cnt) in one matmul, f32 accumulate.
        return acc + jnp.dot(s_r, mask, preferred_element_type=jnp.float32)

    acc = lax.fori_loop(0, rows_per_tile, body,
                        jnp.zeros(out_ref.shape, jnp.float32))
    out_ref[...] += acc


# ----------------------------------------------------------------------------
# Wrapper (coefficient setup, operand packing, pallas_call, tiny epilogue)
# ----------------------------------------------------------------------------
def cons_loss_pallas(pred, gt, boxes):
    """pred: (1, L, H, W) float, gt: (1, H, W) float, boxes: list of (B_g, V, 2)."""
    pred = jnp.asarray(pred, jnp.float32)
    gt = jnp.asarray(gt, jnp.float32)
    _, L, H, W = pred.shape

    # ---- static polygon preprocessing: triarea(a, b, c) = A*col + B*row + C
    coef_cols, group_lengths = [], []
    n_edges = None
    for box_group in boxes:
        bg = np.asarray(box_group, dtype=np.float64)
        group_lengths.append(int(bg.shape[0]))
        for i in range(bg.shape[0]):
            poly = bg[i]
            v = poly.shape[0]
            if n_edges is None:
                n_edges = v
            assert v == n_edges, "all polygons must have the same vertex count"
            colv = []
            for e in range(v):
                a, b = poly[e], poly[(e + 1) % v]
                colv += [0.5 * (a[1] - b[1]),
                         0.5 * (b[0] - a[0]),
                         0.5 * (a[0] * b[1] - b[0] * a[1])]
            coef_cols.append(colv)

    P = len(coef_cols)
    n_pb = max(1, -(-P // _LANES))
    P_pad = n_pb * _LANES
    coef_np = np.zeros((3 * n_edges, P_pad), np.float32)
    coef_np[2, :] = -1.0  # padded polygon slots: edge-0 area = -1 -> empty mask
    if P:
        coef_np[:, :P] = np.asarray(coef_cols, np.float32).T
    coefs = jnp.asarray(coef_np)

    # ---- build the stacked statistics operand S = [pred*g, pred^2*g, g] ----
    R = 2 * L + 1
    Wp = -(-W // _LANES) * _LANES
    g = (gt[0] > 0.0).astype(jnp.float32)                          # (H, W)
    # per-channel centering: variance is shift-invariant -> no cancellation in
    # the one-pass  sum(x^2) - sum(x)^2/n  identity.
    predc = pred[0] - jnp.mean(pred[0], axis=(1, 2), keepdims=True)
    s = jnp.concatenate([predc * g[None],
                         predc * predc * g[None],
                         g[None]], axis=0)                         # (R, H, W)
    # hi/lo bf16 split: exact-to-f32 accuracy through the bf16 MXU matmul.
    s_hi = s.astype(jnp.bfloat16).astype(jnp.float32)
    s_lo = s - s_hi
    s_hilo = jnp.concatenate([s_hi, s_lo], axis=0)                 # (2R, H, W)
    R2 = 2 * R

    # row-tile size: biggest tile under ~4 MiB per (double-buffered) S buffer.
    r2_sl = -(-R2 // 16) * 16                  # bf16 sublane-padded row slab
    row_bytes = r2_sl * Wp * 2
    Tr = int(min(H, max(8, (4 << 20) // row_bytes)))
    Hp = -(-H // Tr) * Tr
    s_hilo = jnp.pad(s_hilo, ((0, 0), (0, Hp - H), (0, Wp - W)))
    s_k = jnp.transpose(s_hilo, (1, 0, 2)).astype(jnp.bfloat16)    # (Hp, 2R, Wp)

    kernel = functools.partial(_cons_loss_kernel, n_edges, Tr)
    out = pl.pallas_call(
        kernel,
        out_shape=jax.ShapeDtypeStruct((R2, P_pad), jnp.float32),
        grid_spec=pltpu.PrefetchScalarGridSpec(
            num_scalar_prefetch=0,
            grid=(n_pb, Hp // Tr),                      # (polygon blocks, row tiles)
            in_specs=[
                pl.BlockSpec((3 * n_edges, _LANES), lambda pb, jr: (0, pb)),
                pl.BlockSpec((Tr, R2, Wp), lambda pb, jr: (jr, 0, 0)),
            ],
            out_specs=pl.BlockSpec((R2, _LANES), lambda pb, jr: (0, pb)),
        ),
        compiler_params=pltpu.CompilerParams(
            dimension_semantics=("parallel", "arbitrary")),
    )(coefs, s_k)

    # ---- tiny O(L*P) epilogue --------------------------------------------
    res = out[:R] + out[R:]                 # undo the hi/lo split
    s1 = res[:L, :P]                        # sum of centered pred per (l, box)
    sq = res[L:2 * L, :P]                   # sum of centered pred^2
    cnt = res[2 * L, :P]                    # positive-pixel count per box
    inv = 1.0 / jnp.maximum(cnt, 1.0)
    ssq = jnp.maximum(sq - s1 * s1 * inv[None, :], 0.0)
    loss_p = jnp.sum(ssq, axis=0) * inv     # (P,)

    # `break` semantics: inside a group, a zero-count box disables itself and
    # every later box of that group -> segmented cumulative product.
    pos = (cnt > 0.0).astype(jnp.float32)
    valids, off = [], 0
    for glen in group_lengths:
        valids.append(jnp.cumprod(pos[off:off + glen]))
        off += glen
    valid = (jnp.concatenate(valids) if valids
             else jnp.zeros((0,), jnp.float32))
    return jnp.sum(loss_p * valid)


# ----------------------------------------------------------------------------
# Pure-numpy reference (mirrors the PyTorch forward exactly)
# ----------------------------------------------------------------------------
def _triarea(a, b, c):
    return 0.5 * (a[0] * b[1] + b[0] * c[:, 1] + c[:, 0] * a[1]
                  - a[0] * c[:, 1] - b[0] * a[1] - c[:, 0] * b[1])


def _within(points, b):
    vis = np.ones((len(points), 1))
    for i in range(b.shape[0]):
        begin, end = b[i], b[(i + 1) % b.shape[0]]
        area = _triarea(begin, end, points)
        vis[np.where(area < 0)] = 0
        if i % 2 == 0:
            vis[np.where(np.abs(area) < 1e-5)] = 0
    return vis


def cons_loss_ref(pred, gt, boxes):
    pred = np.asarray(pred)
    gt = np.asarray(gt)
    pointx, pointy = np.where(gt[0, :, :] > 0)
    points = np.stack([pointy, pointx], axis=1)
    sumloss = 0.0
    for l in range(pred.shape[1]):
        for box in boxes:
            box = np.asarray(box)
            for i in range(box.shape[0]):
                pos = _within(points, box[i])
                pp = points[np.where(pos > 0)[0], :]
                py, px = pp[:, 0], pp[:, 1]
                sub = pred[0, l][px, py]
                if len(sub) == 0:
                    break
                m = np.mean(sub)
                sumloss += np.sum((sub - m) ** 2) / len(sub)
    return sumloss


# ----------------------------------------------------------------------------
if __name__ == "__main__":
    key = jax.random.PRNGKey(0)
    k1, k2 = jax.random.split(key)

    B, L, H, W = 1, 4, 32, 128
    pred = jax.random.normal(k1, (B, L, H, W), dtype=jnp.float32)
    gt = (jax.random.uniform(k2, (B, H, W)) > 0.5).astype(jnp.float32)

    # boxes: list of groups, each (num_boxes, 4, 2) with (x, y) vertices.
    boxes = [
        np.array([[[4.0, 4.0], [40.0, 4.0], [40.0, 20.0], [4.0, 20.0]],
                  [[50.0, 2.0], [120.0, 2.0], [120.0, 30.0], [50.0, 30.0]]],
                 dtype=np.float32),
        np.array([[[200.0, 200.0], [210.0, 200.0], [210.0, 210.0], [200.0, 210.0]],
                  [[10.0, 10.0], [20.0, 10.0], [20.0, 20.0], [10.0, 20.0]]],
                 dtype=np.float32),   # first box empty -> `break` skips second
    ]

    out = cons_loss_pallas(pred, gt, boxes)
    out = jax.block_until_ready(out)

    ref = cons_loss_ref(np.asarray(pred), np.asarray(gt), boxes)
    assert np.allclose(float(out), float(ref), rtol=1e-3, atol=1e-3), \
        (float(out), float(ref))
    print("KERNEL_OK")
</pallas_src>

<mosaic_0001>
module attributes {stable_mosaic.version = 11 : i64} {
  func.func @_cons_loss_kernel(%arg0: i32, %arg1: i32, %arg2: memref<12x128xf32, #tpu.memory_space<vmem>>, %arg3: memref<32x18x128xbf16, #tpu.memory_space<vmem>>, %arg4: memref<18x128xf32, #tpu.memory_space<vmem>>) attributes {dimension_semantics = [#tpu.dimension_semantics<parallel>, #tpu.dimension_semantics<arbitrary>], iteration_bounds = array<i64: 1, 1>, scalar_prefetch = 0 : i64, scratch_operands = 0 : i64, tpu.core_type = #tpu.core_type<tc>, window_params = [{transform_indices = @transform_0, window_bounds = array<i64: 12, 128>}, {transform_indices = @transform_1, window_bounds = array<i64: 32, 18, 128>}, {transform_indices = @transform_2, window_bounds = array<i64: 18, 128>}]} {
    %c0_i32 = arith.constant 0 : i32
    %0 = arith.cmpi eq, %arg1, %c0_i32 : i32
    %1 = arith.extui %0 : i1 to i32
    %c0_i32_0 = arith.constant 0 : i32
    %2 = arith.cmpi ne, %1, %c0_i32_0 : i32
    scf.if %2 {
      %cst_9 = arith.constant 0.000000e+00 : f32
      %13 = vector.broadcast %cst_9 : f32 to vector<18x128xf32>
      %c0_10 = arith.constant 0 : index
      %c0_11 = arith.constant 0 : index
      %14 = vector.load %arg4[%c0_10, %c0_11] : memref<18x128xf32, #tpu.memory_space<vmem>>, vector<18x128xf32>
      tpu.vector_store %arg4[%c0_10, %c0_11], %13 {strides = array<i32>} : memref<18x128xf32, #tpu.memory_space<vmem>>, vector<18x128xf32>,
    } else {
    }
    %3 = tpu.iota {dimensions = array<i32: 0>} : vector<128x1xi32>
    %4 = arith.sitofp %3 : vector<128x1xi32> to vector<128x1xf32>
    %c0 = arith.constant 0 : index
    %c0_1 = arith.constant 0 : index
    %5 = vector.load %arg2[%c0, %c0_1] : memref<12x128xf32, #tpu.memory_space<vmem>>, vector<12x128xf32>
    %c32_i32 = arith.constant 32 : i32
    %6 = arith.muli %arg1, %c32_i32 : i32
    %cst = arith.constant 0.000000e+00 : f32
    %7 = vector.broadcast %cst : f32 to vector<18x128xf32>
    %c0_i32_2 = arith.constant 0 : i32
    %c32_i32_3 = arith.constant 32 : i32
    %8 = arith.addi %c0_i32_2, %c32_i32_3 : i32
    %c1_i32 = arith.constant 1 : i32
    %9 = scf.for %arg5 = %c0_i32_2 to %8 step %c1_i32 iter_args(%arg6 = %7) -> (vector<18x128xf32>)  : i32 {
      %13 = arith.addi %6, %arg5 : i32
      %14 = arith.sitofp %13 : i32 to f32
      %15 = arith.index_cast %arg5 : i32 to index
      %c0_9 = arith.constant 0 : index
      %c0_10 = arith.constant 0 : index
      %16 = vector.load %arg3[%15, %c0_9, %c0_10] : memref<32x18x128xbf16, #tpu.memory_space<vmem>>, vector<1x18x128xbf16>
      %17 = vector.shape_cast %16 : vector<1x18x128xbf16> to vector<18x128xbf16>
      %18 = vector.extract_strided_slice %5 {offsets = [0, 0], sizes = [1, 128], strides = [1, 1]} : vector<12x128xf32> to vector<1x128xf32>
      %19 = vector.extract_strided_slice %5 {offsets = [1, 0], sizes = [1, 128], strides = [1, 1]} : vector<12x128xf32> to vector<1x128xf32>
      %20 = vector.extract_strided_slice %5 {offsets = [2, 0], sizes = [1, 128], strides = [1, 1]} : vector<12x128xf32> to vector<1x128xf32>
      %21 = vector.broadcast %4 : vector<128x1xf32> to vector<128x128xf32>
      %22 = vector.broadcast %18 : vector<1x128xf32> to vector<128x128xf32>
      %23 = arith.mulf %21, %22 : vector<128x128xf32>
      %24 = vector.broadcast %14 : f32 to vector<1x128xf32>
      %25 = arith.mulf %19, %24 : vector<1x128xf32>
      %26 = arith.addf %25, %20 : vector<1x128xf32>
      %27 = vector.broadcast %26 : vector<1x128xf32> to vector<128x128xf32>
      %28 = arith.addf %23, %27 : vector<128x128xf32>
      %cst_11 = arith.constant 9.99999974E-6 : f32
      %29 = vector.broadcast %cst_11 : f32 to vector<128x128xf32>
      %30 = arith.cmpf oge, %28, %29 : vector<128x128xf32>
      %31 = vector.extract_strided_slice %5 {offsets = [3, 0], sizes = [1, 128], strides = [1, 1]} : vector<12x128xf32> to vector<1x128xf32>
      %32 = vector.extract_strided_slice %5 {offsets = [4, 0], sizes = [1, 128], strides = [1, 1]} : vector<12x128xf32> to vector<1x128xf32>
      %33 = vector.extract_strided_slice %5 {offsets = [5, 0], sizes = [1, 128], strides = [1, 1]} : vector<12x128xf32> to vector<1x128xf32>
      %34 = vector.broadcast %4 : vector<128x1xf32> to vector<128x128xf32>
      %35 = vector.broadcast %31 : vector<1x128xf32> to vector<128x128xf32>
      %36 = arith.mulf %34, %35 : vector<128x128xf32>
      %37 = vector.broadcast %14 : f32 to vector<1x128xf32>
      %38 = arith.mulf %32, %37 : vector<1x128xf32>
      %39 = arith.addf %38, %33 : vector<1x128xf32>
      %40 = vector.broadcast %39 : vector<1x128xf32> to vector<128x128xf32>
      %41 = arith.addf %36, %40 : vector<128x128xf32>
      %cst_12 = arith.constant 0.000000e+00 : f32
      %42 = vector.broadcast %cst_12 : f32 to vector<128x128xf32>
      %43 = arith.cmpf oge, %41, %42 : vector<128x128xf32>
      %44 = arith.andi %30, %43 : vector<128x128xi1>
      %45 = vector.extract_strided_slice %5 {offsets = [6, 0], sizes = [1, 128], strides = [1, 1]} : vector<12x128xf32> to vector<1x128xf32>
      %46 = vector.extract_strided_slice %5 {offsets = [7, 0], sizes = [1, 128], strides = [1, 1]} : vector<12x128xf32> to vector<1x128xf32>
      %47 = vector.extract_strided_slice %5 {offsets = [8, 0], sizes = [1, 128], strides = [1, 1]} : vector<12x128xf32> to vector<1x128xf32>
      %48 = vector.broadcast %4 : vector<128x1xf32> to vector<128x128xf32>
      %49 = vector.broadcast %45 : vector<1x128xf32> to vector<128x128xf32>
      %50 = arith.mulf %48, %49 : vector<128x128xf32>
      %51 = vector.broadcast %14 : f32 to vector<1x128xf32>
      %52 = arith.mulf %46, %51 : vector<1x128xf32>
      %53 = arith.addf %52, %47 : vector<1x128xf32>
      %54 = vector.broadcast %53 : vector<1x128xf32> to vector<128x128xf32>
      %55 = arith.addf %50, %54 : vector<128x128xf32>
      %cst_13 = arith.constant 9.99999974E-6 : f32
      %56 = vector.broadcast %cst_13 : f32 to vector<128x128xf32>
      %57 = arith.cmpf oge, %55, %56 : vector<128x128xf32>
      %58 = arith.andi %44, %57 : vector<128x128xi1>
      %59 = vector.extract_strided_slice %5 {offsets = [9, 0], sizes = [1, 128], strides = [1, 1]} : vector<12x128xf32> to vector<1x128xf32>
      %60 = vector.extract_strided_slice %5 {offsets = [10, 0], sizes = [1, 128], strides = [1, 1]} : vector<12x128xf32> to vector<1x128xf32>
      %61 = vector.extract_strided_slice %5 {offsets = [11, 0], sizes = [1, 128], strides = [1, 1]} : vector<12x128xf32> to vector<1x128xf32>
      %62 = vector.broadcast %4 : vector<128x1xf32> to vector<128x128xf32>
      %63 = vector.broadcast %59 : vector<1x128xf32> to vector<128x128xf32>
      %64 = arith.mulf %62, %63 : vector<128x128xf32>
      %65 = vector.broadcast %14 : f32 to vector<1x128xf32>
      %66 = arith.mulf %60, %65 : vector<1x128xf32>
      %67 = arith.addf %66, %61 : vector<1x128xf32>
      %68 = vector.broadcast %67 : vector<1x128xf32> to vector<128x128xf32>
      %69 = arith.addf %64, %68 : vector<128x128xf32>
      %cst_14 = arith.constant 0.000000e+00 : f32
      %70 = vector.broadcast %cst_14 : f32 to vector<128x128xf32>
      %71 = arith.cmpf oge, %69, %70 : vector<128x128xf32>
      %72 = arith.andi %58, %71 : vector<128x128xi1>
      %cst_15 = arith.constant 1.000000e+00 : f32
      %cst_16 = arith.constant 0.000000e+00 : f32
      %73 = vector.broadcast %cst_15 : f32 to vector<128x128xf32>
      %74 = vector.broadcast %cst_16 : f32 to vector<128x128xf32>
      %75 = arith.select %72, %73, %74 : vector<128x128xi1>, vector<128x128xf32>
      %76 = arith.truncf %75 : vector<128x128xf32> to vector<128x128xbf16>
      %cst_17 = arith.constant dense<0.000000e+00> : vector<18x128xf32>
      %77 = tpu.matmul %17, %76, %cst_17 {dimension_numbers = #tpu.dot_dimension_numbers<[1], [0], [0], [1], [0, 0, 1, 1], [], []>} : vector<18x128xbf16>, vector<128x128xbf16>, vector<18x128xf32> -> vector<18x128xf32>
      %78 = arith.addf %arg6, %77 : vector<18x128xf32>
      scf.yield %78 : vector<18x128xf32>
    }
    %c32_i32_4 = arith.constant 32 : i32
    %c0_5 = arith.constant 0 : index
    %c0_6 = arith.constant 0 : index
    %10 = vector.load %arg4[%c0_5, %c0_6] : memref<18x128xf32, #tpu.memory_space<vmem>>, vector<18x128xf32>
    %11 = arith.addf %10, %9 : vector<18x128xf32>
    %c0_7 = arith.constant 0 : index
    %c0_8 = arith.constant 0 : index
    %12 = vector.load %arg4[%c0_7, %c0_8] : memref<18x128xf32, #tpu.memory_space<vmem>>, vector<18x128xf32>
    tpu.vector_store %arg4[%c0_7, %c0_8], %11 {strides = array<i32>} : memref<18x128xf32, #tpu.memory_space<vmem>>, vector<18x128xf32>,
    return
  }
  func.func @transform_0(%arg0: i32, %arg1: i32) -> (i32, i32) {
    %c0_i32 = arith.constant 0 : i32
    %c0_i32_0 = arith.constant 0 : i32
    return %c0_i32, %arg0 : i32, i32
  }
  func.func @transform_1(%arg0: i32, %arg1: i32) -> (i32, i32, i32) {
    %c0_i32 = arith.constant 0 : i32
    %c0_i32_0 = arith.constant 0 : i32
    %c0_i32_1 = arith.constant 0 : i32
    return %arg1, %c0_i32, %c0_i32_0 : i32, i32, i32
  }
  func.func @transform_2(%arg0: i32, %arg1: i32) -> (i32, i32) {
    %c0_i32 = arith.constant 0 : i32
    %c0_i32_0 = arith.constant 0 : i32
    return %c0_i32, %arg0 : i32, i32
  }
}

</mosaic_0001>

<bundles_post_ra>
// kernel: tpu_custom_call.1
= control target key start
LH: loop header
LB: loop body
LE: loop exit
PB: predicated region body
PF: predicated region fallthrough
CT: control target
= control target key end

     0   :  { %7 = vsyncpa [#allocation3], 0  ;;  %v20_v0 = vlaneseq  ;;  %v626_v3 = vmov 0.0   ;;  %v706_v36 = vmov 0.0   ;;  %v708_v37 = vmov 0.0   ;;  %s1041_s0 = inlined_call_operand.vmem [shape: f32[12,128], index: 0, kind: input, shape index: {}]   ;;  %s1042_s1 = inlined_call_operand.vmem [shape: bf16[32,18,128], index: 1, kind: input, shape index: {}]   ;;  %s1043_s2 = inlined_call_operand.hbm [shape: f32[18,128], index: 2, kind: output, shape index: {}]  }
   0x1   :  { %v649_v1 = vld [vmem:[%s1041_s0] sm:$0xff]  ;;  %v654_v2 = vld [vmem:[%s1041_s0 + $0x8] sm:$0xf]  ;;  %17 = vst [vmem:[#allocation2] sm:$0xff] %v626_v3  ;;  %18 = vst [vmem:[#allocation2 + $0x8] sm:$0xff] %v626_v3  ;;  %v710_v38 = vmov 0.0  }
   0x2   :  { %19 = vst [vmem:[#allocation2 + $0x10] sm:$0x3] %v626_v3  ;;  %v656_v4 = vshrl.u32 %v20_v0, 7  ;;  %s712_s0 = smov 0  }
   0x4   :  { %v22_v5 = vadd.s32 8, %v656_v4  ;;  %v23_v6 = vadd.s32 16, %v656_v4  ;;  %v24_v7 = vadd.s32 24, %v656_v4  ;;  %v25_v8 = vadd.s32 32, %v656_v4 }
   0x5   :  { %v26_v9 = vadd.s32 40, %v656_v4  ;;  %v27_v10 = vadd.s32 48, %v656_v4  ;;  %v28_v11 = vadd.s32 56, %v656_v4  ;;  %v29_v12 = vadd.s32 64, %v656_v4 }
   0x6   :  { %v30_v13 = vadd.s32 72, %v656_v4  ;;  %v31_v14 = vadd.s32 80, %v656_v4  ;;  %v32_v15 = vadd.s32 88, %v656_v4  ;;  %v33_v16 = vadd.s32 96, %v656_v4 }
   0x7   :  { %v34_v17 = vadd.s32 104, %v656_v4  ;;  %v35_v18 = vadd.s32 112, %v656_v4  ;;  %v36_v19 = vadd.s32 120, %v656_v4  ;;  %v674_v20 = vcvt.s32.f32 %v656_v4 }
   0x8   :  { %v676_v21 = vcvt.s32.f32 %v22_v5  ;;  %v678_v22 = vcvt.s32.f32 %v23_v6  ;;  %v680_v23 = vcvt.s32.f32 %v24_v7  ;;  %v682_v24 = vcvt.s32.f32 %v25_v8 }
   0x9   :  { %v684_v25 = vcvt.s32.f32 %v26_v9  ;;  %v686_v26 = vcvt.s32.f32 %v27_v10  ;;  %v688_v27 = vcvt.s32.f32 %v28_v11  ;;  %v690_v28 = vcvt.s32.f32 %v29_v12 }
   0xa   :  { %v692_v29 = vcvt.s32.f32 %v30_v13  ;;  %v694_v30 = vcvt.s32.f32 %v31_v14  ;;  %v696_v31 = vcvt.s32.f32 %v32_v15  ;;  %v698_v32 = vcvt.s32.f32 %v33_v16 }
   0xb   :  { %v700_v33 = vcvt.s32.f32 %v34_v17  ;;  %v702_v34 = vcvt.s32.f32 %v35_v18  ;;  %v704_v35 = vcvt.s32.f32 %v36_v19 }
   0xc LB: > { %v75_v39 = vsub.s32 0, %v656_v4  ;;  %v101_v40 = vsub.s32 1, %v656_v4  ;;  %v137_v41 = vsub.s32 3, %v656_v4  ;;  %v209_v42 = vsub.s32 6, %v656_v4  ;;  %s66_s13 = scvt.s32.f32 %s624_s0  ;;  %s502_s14 = smul.u32 12, %s624_s0  ;;  %s624_s0 = sphi %s712_s0, %s61_s0   ;;  %v620_v38 = vphi %v710_v38, %v1060_v38   ;;  %v616_v37 = vphi %v708_v37, %v1059_v37   ;;  %v612_v36 = vphi %v706_v36, %v1058_v36  }
   0xd   : > { %v96_v45 = vrot.slane %v649_v1, 1  ;;  %v228_v47 = vrot.slane %v654_v2, 1  ;;  %v157_v50 = vsub.s32 4, %v656_v4  ;;  %v233_v51 = vsub.s32 7, %v656_v4  ;;  %s61_s0 = sadd.s32 1, %s624_s0  }
   0xe   : > { %v732_v43 = vrot.slane %v649_v1, %v75_v39  ;;  %v735_v44 = vrot.slane %v649_v1, %v137_v41  ;;  %v740_v46 = vrot.slane %v649_v1, %v209_v42  ;;  %v744_v48 = vrot.slane %v654_v2, %v101_v40  ;;  %s752_s17 = scalar_lea.vmem %s1042_s1, %s502_s14  ;;  %p58_p0 = scmp.ge.s32.totalorder %s61_s0, 32  }
   0xf   : > { %v93_v49 = vstv %s66_s13  ;;  %v307_v52 = vsub.s32 2, %v656_v4  ;;  %v570_v57 = vld [vmem:[%s752_s17] sm:$0xff]   ;;  %s628_s18 = smov (%p58_p0), [#allocation2]  }
  0x10   : > { %v91_v53 = vmul.f32 %v732_v43, %v702_v34  ;;  %v92_v54 = vmul.f32 %v732_v43, %v704_v35  ;;  %v94_v55 = vmul.f32 %v93_v49, %v649_v1  ;;  %v153_v56 = vmul.f32 %v735_v44, %v702_v34  ;;  %529 = vmatprep.mubr.bf16.mxu0 %v570_v57  ;;  %s456_s19 = sshll.u32 (%p58_p0), %s628_s18, 4  ;;  %s457_s19 = int_to_ptr.vmem [resolvable:$true] %s456_s19 }
  0x11   : > { %v154_v58 = vmul.f32 %v735_v44, %v704_v35  ;;  %v225_v59 = vmul.f32 %v740_v46, %v702_v34  ;;  %v226_v60 = vmul.f32 %v740_v46, %v704_v35  ;;  %v303_v61 = vmul.f32 %v93_v49, %v654_v2  ;;  %s572_s20 = scalar_lea.vmem (%p58_p0), %s457_s19, 384  ;;  %p577_p2 = scmp.lt.s32.totalorder (%p58_p0), %s457_s19, %s457_s19 }
  0x12   : > { %v98_v62 = vadd.f32 %v96_v45, %v94_v55  ;;  %v230_v63 = vadd.f32 %v228_v47, %v94_v55  ;;  %v301_v0 = vmul.f32 %v744_v48, %v702_v34  ;;  %v302_v3 = vmul.f32 %v744_v48, %v704_v35  ;;  %p573_p1 = scmp.ne.s32.totalorder (%p58_p0), %s457_s19, %s572_s20  ;;  %p578_p3 = scmp.lt.s32.totalorder (%p58_p0), %s572_s20, %s572_s20 }
  0x13   : > { %v304_v5 = vadd.f32 %v303_v61, %v228_v47  ;;  %v89_v6 = vmul.f32 %v732_v43, %v698_v32  ;;  %v90_v7 = vmul.f32 %v732_v43, %v700_v33  ;;  %v151_v8 = vmul.f32 %v735_v44, %v698_v32 }
  0x14   : > { %v779_v9 = vrot.slane %v98_v62, %v101_v40  ;;  %v781_v10 = vrot.slane %v98_v62, %v157_v50  ;;  %v783_v11 = vrot.slane %v230_v63, %v233_v51  ;;  %v152_v12 = vmul.f32 %v735_v44, %v700_v33  ;;  %p579_p4 = por (%p58_p0), %p578_p3, %p577_p2 }
  0x15   : > { %v787_v13 = vrot.slane %v304_v5, %v307_v52  ;;  %v223_v14 = vmul.f32 %v740_v46, %v698_v32  ;;  %v224_v15 = vmul.f32 %v740_v46, %v700_v33  ;;  %v299_v16 = vmul.f32 %v744_v48, %v698_v32 }
  0x16   : > { %v117_v17 = vadd.f32 %v779_v9, %v91_v53  ;;  %v118_v18 = vadd.f32 %v779_v9, %v92_v54  ;;  %v173_v19 = vadd.f32 %v781_v10, %v153_v56  ;;  %v174_v39 = vadd.f32 %v781_v10, %v154_v58  ;;  %p580_p5 = pnand (%p58_p0), %p579_p4, %p573_p1 }
  0x17   : > { %v249_v40 = vadd.f32 %v783_v11, %v225_v59  ;;  %v250_v41 = vadd.f32 %v783_v11, %v226_v60  ;;  %v323_v42 = vadd.f32 %v787_v13, %v301_v0  ;;  %v324_v45 = vadd.f32 %v787_v13, %v302_v3 }
  0x18   : > { %vm133_vm0 = vcmp.ge.f32.partialorder %v117_v17, 1e-05  ;;  %vm134_vm1 = vcmp.ge.f32.partialorder %v118_v18, 1e-05  ;;  %vm189_vm2 = vcmp.ge.f32.partialorder %v173_v19, 0.0  ;;  %vm190_vm3 = vcmp.ge.f32.partialorder %v174_v39, 0.0 }
  0x19   : > { %vm205_vm4 = vmand %vm133_vm0, %vm189_vm2  ;;  %vm265_vm5 = vcmp.ge.f32.partialorder %v249_v40, 1e-05  ;;  %vm266_vm6 = vcmp.ge.f32.partialorder %v250_v41, 1e-05  ;;  %vm339_vm7 = vcmp.ge.f32.partialorder %v323_v42, 0.0  ;;  %v300_v47 = vmul.f32 %v744_v48, %v700_v33 }
  0x1a   : > { %vm206_vm8 = vmand %vm134_vm1, %vm190_vm3  ;;  %v115_v49 = vadd.f32 %v779_v9, %v89_v6  ;;  %v116_v50 = vadd.f32 %v779_v9, %v90_v7  ;;  %v171_v51 = vadd.f32 %v781_v10, %v151_v8  ;;  %v172_v52 = vadd.f32 %v781_v10, %v152_v12 }
  0x1b   : > { %vm281_vm9 = vmand %vm205_vm4, %vm265_vm5  ;;  %vm340_vm10 = vcmp.ge.f32.partialorder %v324_v45, 0.0  ;;  %v247_v53 = vadd.f32 %v783_v11, %v223_v14  ;;  %v87_v54 = vmul.f32 %v732_v43, %v694_v30  ;;  %v248_v55 = vadd.f32 %v783_v11, %v224_v15 }
  0x1c   : > { %vm282_vm11 = vmand %vm206_vm8, %vm266_vm6  ;;  %v321_v56 = vadd.f32 %v787_v13, %v299_v16  ;;  %v88_v57 = vmul.f32 %v732_v43, %v696_v31  ;;  %vm131_vm13 = vcmp.ge.f32.partialorder %v115_v49, 1e-05  ;;  %vm132_vm14 = vcmp.ge.f32.partialorder %v116_v50, 1e-05 }
  0x1d   : > { %vm817_vm12 = vmand %vm281_vm9, %vm339_vm7  ;;  %vm187_vm15 = vcmp.ge.f32.partialorder %v171_v51, 0.0  ;;  %v322_v59 = vadd.f32 %v787_v13, %v300_v47  ;;  %vm188_vm1 = vcmp.ge.f32.partialorder %v172_v52, 0.0  ;;  %vm263_vm2 = vcmp.ge.f32.partialorder %v247_v53, 1e-05 }
  0x1e   : > { %vm822_vm0 = vmand %vm282_vm11, %vm340_vm10  ;;  %v149_v61 = vmul.f32 %v735_v44, %v694_v30  ;;  %v150_v62 = vmul.f32 %v735_v44, %v696_v31  ;;  %v113_v63 = vadd.f32 %v779_v9, %v87_v54  ;;  %v221_v0 = vmul.f32 %v740_v46, %v694_v30 }
  0x1f   : > { %vm486_vm3 = vmpackc.low %vm822_vm0, %vm817_vm12  ;;  %v222_v3 = vmul.f32 %v740_v46, %v696_v31  ;;  %v297_v5 = vmul.f32 %v744_v48, %v694_v30  ;;  %v627_v6 = vmov 1.0|1.0   ;;  %vm264_vm5 = vcmp.ge.f32.partialorder %v248_v55, 1e-05 }
  0x20   : > { %513 = vmatprep.subr.msk.bf16.mxu0 %vm486_vm3, %v627_v6  ;;  %vm203_vm4 = vmand %vm131_vm13, %vm187_vm15  ;;  %v169_v7 = vadd.f32 %v781_v10, %v149_v61  ;;  %vm337_vm7 = vcmp.ge.f32.partialorder %v321_v56, 0.0  ;;  %v114_v8 = vadd.f32 %v779_v9, %v88_v57  ;;  %v170_v12 = vadd.f32 %v781_v10, %v150_v62 }
  0x21   : > { %514 = vmatpush3.bf16.msk.msra.mxu0 %vm486_vm3, %v627_v6  ;;  %vm204_vm6 = vmand %vm132_vm14, %vm188_vm1  ;;  %v298_v14 = vmul.f32 %v744_v48, %v696_v31  ;;  %vm338_vm9 = vcmp.ge.f32.partialorder %v322_v59, 0.0  ;;  %v245_v15 = vadd.f32 %v783_v11, %v221_v0  ;;  %v85_v16 = vmul.f32 %v732_v43, %v690_v28 }
  0x22   : > { %vm279_vm8 = vmand %vm203_vm4, %vm263_vm2  ;;  %vm129_vm11 = vcmp.ge.f32.partialorder %v113_v63, 1e-05  ;;  %v246_v17 = vadd.f32 %v783_v11, %v222_v3  ;;  %v319_v18 = vadd.f32 %v787_v13, %v297_v5  ;;  %vm185_vm13 = vcmp.ge.f32.partialorder %v169_v7, 0.0 }
  0x23   : > { %vm280_vm10 = vmand %vm204_vm6, %vm264_vm5  ;;  %v86_v39 = vmul.f32 %v732_v43, %v692_v29  ;;  %v147_v40 = vmul.f32 %v735_v44, %v690_v28  ;;  %v148_v41 = vmul.f32 %v735_v44, %v692_v29  ;;  %vm130_vm15 = vcmp.ge.f32.partialorder %v114_v8, 1e-05 }
  0x24   : > { %vm857_vm12 = vmand %vm279_vm8, %vm337_vm7  ;;  %vm186_vm0 = vcmp.ge.f32.partialorder %v170_v12, 0.0  ;;  %v320_v42 = vadd.f32 %v787_v13, %v298_v14  ;;  %v219_v45 = vmul.f32 %v740_v46, %v690_v28  ;;  %vm261_vm2 = vcmp.ge.f32.partialorder %v245_v15, 1e-05 }
  0x25   : > { %vm354_vm14 = vmand %vm280_vm10, %vm338_vm9  ;;  %v111_v47 = vadd.f32 %v779_v9, %v85_v16  ;;  %v220_v49 = vmul.f32 %v740_v46, %v692_v29  ;;  %vm262_vm4 = vcmp.ge.f32.partialorder %v246_v17, 1e-05  ;;  %v167_v50 = vadd.f32 %v781_v10, %v147_v40 }
  0x26   : > { %vm488_vm1 = vmpackc.low %vm354_vm14, %vm857_vm12  ;;  %v295_v51 = vmul.f32 %v744_v48, %v690_v28  ;;  %vm335_vm6 = vcmp.ge.f32.partialorder %v319_v18, 0.0  ;;  %v112_v52 = vadd.f32 %v779_v9, %v86_v39  ;;  %v168_v53 = vadd.f32 %v781_v10, %v148_v41 }
  0x27   : > { %515 = vmatprep.subr.msk.bf16.mxu0 %vm488_vm1, %v627_v6  ;;  %vm201_vm3 = vmand %vm129_vm11, %vm185_vm13  ;;  %v296_v54 = vmul.f32 %v744_v48, %v692_v29  ;;  %vm336_vm8 = vcmp.ge.f32.partialorder %v320_v42, 0.0  ;;  %v243_v55 = vadd.f32 %v783_v11, %v219_v45  ;;  %v83_v56 = vmul.f32 %v732_v43, %v686_v26 }
  0x28   : > { %516 = vmatpush3.bf16.msk.msra.mxu0 %vm488_vm1, %v627_v6  ;;  %vm202_vm5 = vmand %vm130_vm15, %vm186_vm0  ;;  %vm127_vm10 = vcmp.ge.f32.partialorder %v111_v47, 1e-05  ;;  %v244_v57 = vadd.f32 %v783_v11, %v220_v49  ;;  %v145_v58 = vmul.f32 %v735_v44, %v686_v26  ;;  %vm183_vm12 = vcmp.ge.f32.partialorder %v167_v50, 0.0 }
  0x29   : > { %vm277_vm7 = vmand %vm201_vm3, %vm261_vm2  ;;  %v317_v60 = vadd.f32 %v787_v13, %v295_v51  ;;  %v84_v61 = vmul.f32 %v732_v43, %v688_v27  ;;  %v146_v62 = vmul.f32 %v735_v44, %v688_v27  ;;  %vm128_vm14 = vcmp.ge.f32.partialorder %v112_v52, 1e-05 }
  0x2a   : > { %vm278_vm9 = vmand %vm202_vm5, %vm262_vm4  ;;  %vm184_vm15 = vcmp.ge.f32.partialorder %v168_v53, 0.0  ;;  %v318_v63 = vadd.f32 %v787_v13, %v296_v54  ;;  %v217_v0 = vmul.f32 %v740_v46, %v686_v26  ;;  %vm259_vm1 = vcmp.ge.f32.partialorder %v243_v55, 1e-05 }
  0x2b   : > { %vm891_vm11 = vmand %vm277_vm7, %vm335_vm6  ;;  %v109_v3 = vadd.f32 %v779_v9, %v83_v56  ;;  %v218_v5 = vmul.f32 %v740_v46, %v688_v27  ;;  %vm260_vm3 = vcmp.ge.f32.partialorder %v244_v57, 1e-05  ;;  %v165_v7 = vadd.f32 %v781_v10, %v145_v58 }
  0x2c   : > { %vm352_vm13 = vmand %vm278_vm9, %vm336_vm8  ;;  %v293_v8 = vmul.f32 %v744_v48, %v686_v26  ;;  %vm333_vm5 = vcmp.ge.f32.partialorder %v317_v60, 0.0  ;;  %v110_v12 = vadd.f32 %v779_v9, %v84_v61  ;;  %v166_v14 = vadd.f32 %v781_v10, %v146_v62 }
  0x2d   : > { %vm490_vm0 = vmpackc.low %vm352_vm13, %vm891_vm11  ;;  %v294_v15 = vmul.f32 %v744_v48, %v688_v27  ;;  %vm334_vm7 = vcmp.ge.f32.partialorder %v318_v63, 0.0  ;;  %v241_v16 = vadd.f32 %v783_v11, %v217_v0  ;;  %v81_v17 = vmul.f32 %v732_v43, %v682_v24 }
  0x2e   : > { %517 = vmatprep.subr.msk.bf16.mxu0 %vm490_vm0, %v627_v6  ;;  %vm199_vm2 = vmand %vm127_vm10, %vm183_vm12  ;;  %vm125_vm9 = vcmp.ge.f32.partialorder %v109_v3, 1e-05  ;;  %v242_v18 = vadd.f32 %v783_v11, %v218_v5  ;;  %v143_v19 = vmul.f32 %v735_v44, %v682_v24  ;;  %vm181_vm11 = vcmp.ge.f32.partialorder %v165_v7, 0.0 }
  0x2f   : > { %518 = vmatpush3.bf16.msk.msra.mxu0 %vm490_vm0, %v627_v6  ;;  %vm200_vm4 = vmand %vm128_vm14, %vm184_vm15  ;;  %v315_v40 = vadd.f32 %v787_v13, %v293_v8  ;;  %v82_v41 = vmul.f32 %v732_v43, %v684_v25  ;;  %v144_v42 = vmul.f32 %v735_v44, %v684_v25  ;;  %vm126_vm13 = vcmp.ge.f32.partialorder %v110_v12, 1e-05 }
  0x30   : > { %vm275_vm6 = vmand %vm199_vm2, %vm259_vm1  ;;  %vm182_vm14 = vcmp.ge.f32.partialorder %v166_v14, 0.0  ;;  %v316_v45 = vadd.f32 %v787_v13, %v294_v15  ;;  %v215_v47 = vmul.f32 %v740_v46, %v682_v24  ;;  %vm257_vm0 = vcmp.ge.f32.partialorder %v241_v16, 1e-05 }
  0x31   : > { %vm276_vm8 = vmand %vm200_vm4, %vm260_vm3  ;;  %v107_v49 = vadd.f32 %v779_v9, %v81_v17  ;;  %v216_v50 = vmul.f32 %v740_v46, %v684_v25  ;;  %vm258_vm2 = vcmp.ge.f32.partialorder %v242_v18, 1e-05  ;;  %v163_v51 = vadd.f32 %v781_v10, %v143_v19 }
  0x32   : > { %vm924_vm10 = vmand %vm275_vm6, %vm333_vm5  ;;  %v291_v52 = vmul.f32 %v744_v48, %v682_v24  ;;  %vm331_vm4 = vcmp.ge.f32.partialorder %v315_v40, 0.0  ;;  %v108_v53 = vadd.f32 %v779_v9, %v82_v41  ;;  %v164_v54 = vadd.f32 %v781_v10, %v144_v42 }
  0x33   : > { %vm350_vm12 = vmand %vm276_vm8, %vm334_vm7  ;;  %v292_v55 = vmul.f32 %v744_v48, %v684_v25  ;;  %vm332_vm6 = vcmp.ge.f32.partialorder %v316_v45, 0.0  ;;  %v239_v56 = vadd.f32 %v783_v11, %v215_v47  ;;  %v79_v57 = vmul.f32 %v732_v43, %v678_v22 }
  0x34   : > { %vm492_vm15 = vmpackc.low %vm350_vm12, %vm924_vm10  ;;  %vm123_vm8 = vcmp.ge.f32.partialorder %v107_v49, 1e-05  ;;  %v240_v58 = vadd.f32 %v783_v11, %v216_v50  ;;  %v141_v59 = vmul.f32 %v735_v44, %v678_v22  ;;  %vm179_vm10 = vcmp.ge.f32.partialorder %v163_v51, 0.0 }
  0x35   : > { %519 = vmatprep.subr.msk.bf16.mxu0 %vm492_vm15, %v627_v6  ;;  %vm197_vm1 = vmand %vm125_vm9, %vm181_vm11  ;;  %v313_v61 = vadd.f32 %v787_v13, %v291_v52  ;;  %v80_v62 = vmul.f32 %v732_v43, %v680_v23  ;;  %v142_v63 = vmul.f32 %v735_v44, %v680_v23  ;;  %vm124_vm12 = vcmp.ge.f32.partialorder %v108_v53, 1e-05 }
  0x36   : > { %520 = vmatpush3.bf16.msk.msra.mxu0 %vm492_vm15, %v627_v6  ;;  %vm198_vm3 = vmand %vm126_vm13, %vm182_vm14  ;;  %vm180_vm13 = vcmp.ge.f32.partialorder %v164_v54, 0.0  ;;  %v314_v0 = vadd.f32 %v787_v13, %v292_v55  ;;  %v213_v3 = vmul.f32 %v740_v46, %v678_v22  ;;  %vm255_vm15 = vcmp.ge.f32.partialorder %v239_v56, 1e-05 }
  0x37   : > { %vm273_vm5 = vmand %vm197_vm1, %vm257_vm0  ;;  %v105_v5 = vadd.f32 %v779_v9, %v79_v57  ;;  %v214_v7 = vmul.f32 %v740_v46, %v680_v23  ;;  %vm256_vm1 = vcmp.ge.f32.partialorder %v240_v58, 1e-05  ;;  %v161_v8 = vadd.f32 %v781_v10, %v141_v59 }
  0x38   : > { %vm274_vm7 = vmand %vm198_vm3, %vm258_vm2  ;;  %v289_v12 = vmul.f32 %v744_v48, %v678_v22  ;;  %vm329_vm3 = vcmp.ge.f32.partialorder %v313_v61, 0.0  ;;  %v106_v14 = vadd.f32 %v779_v9, %v80_v62  ;;  %v162_v15 = vadd.f32 %v781_v10, %v142_v63  ;;  %v443_v61 = vld [vmem:[#allocation2 + $0x8] sm:$0xff] (%p58_p0)  ;;  %v444_v62 = vld [vmem:[#allocation2 + $0x10] sm:$0x3] (%p58_p0) }
  0x39   : > { %vm957_vm9 = vmand %vm273_vm5, %vm331_vm4  ;;  %v290_v16 = vmul.f32 %v744_v48, %v680_v23  ;;  %vm330_vm5 = vcmp.ge.f32.partialorder %v314_v0, 0.0  ;;  %v237_v17 = vadd.f32 %v783_v11, %v213_v3  ;;  %v238_v18 = vadd.f32 %v783_v11, %v214_v7 }
  0x3a   : > { %vm348_vm11 = vmand %vm274_vm7, %vm332_vm6  ;;  %vm121_vm7 = vcmp.ge.f32.partialorder %v105_v5, 1e-05  ;;  %v77_v19 = vmul.f32 %v732_v43, %v674_v20  ;;  %v139_v39 = vmul.f32 %v735_v44, %v674_v20  ;;  %v311_v41 = vadd.f32 %v787_v13, %v289_v12 }
  0x3b   : > { %vm494_vm14 = vmpackc.low %vm348_vm11, %vm957_vm9  ;;  %vm177_vm9 = vcmp.ge.f32.partialorder %v161_v8, 0.0  ;;  %v78_v42 = vmul.f32 %v732_v43, %v676_v21  ;;  %v140_v45 = vmul.f32 %v735_v44, %v676_v21  ;;  %vm122_vm11 = vcmp.ge.f32.partialorder %v106_v14, 1e-05 }
  0x3c   : > { %521 = vmatprep.subr.msk.bf16.mxu0 %vm494_vm14, %v627_v6  ;;  %vm195_vm0 = vmand %vm123_vm8, %vm179_vm10  ;;  %v312_v47 = vadd.f32 %v787_v13, %v290_v16  ;;  %v211_v49 = vmul.f32 %v740_v46, %v674_v20  ;;  %v212_v50 = vmul.f32 %v740_v46, %v676_v21  ;;  %v103_v43 = vadd.f32 %v779_v9, %v77_v19 }
  0x3d   : > { %522 = vmatpush3.bf16.msk.msra.mxu0 %vm494_vm14, %v627_v6  ;;  %vm196_vm2 = vmand %vm124_vm12, %vm180_vm13  ;;  %vm178_vm12 = vcmp.ge.f32.partialorder %v162_v15, 0.0  ;;  %vm253_vm14 = vcmp.ge.f32.partialorder %v237_v17, 1e-05  ;;  %v159_v44 = vadd.f32 %v781_v10, %v139_v39  ;;  %v287_v51 = vmul.f32 %v744_v48, %v674_v20 }
  0x3e   : > { %vm271_vm4 = vmand %vm195_vm0, %vm255_vm15  ;;  %vm254_vm0 = vcmp.ge.f32.partialorder %v238_v18, 1e-05  ;;  %v104_v52 = vadd.f32 %v779_v9, %v78_v42  ;;  %v160_v46 = vadd.f32 %v781_v10, %v140_v45  ;;  %v288_v53 = vmul.f32 %v744_v48, %v676_v21  ;;  %v571_v48 = vld [vmem:[%s752_s17 + $0x8] ss:$0 sps:$4 sm:$0x11]  }
  0x3f   : > { %vm272_vm6 = vmand %vm196_vm2, %vm256_vm1  ;;  %vm327_vm2 = vcmp.ge.f32.partialorder %v311_v41, 0.0  ;;  %v235_v54 = vadd.f32 %v783_v11, %v211_v49  ;;  %v236_v55 = vadd.f32 %v783_v11, %v212_v50  ;;  %v309_v56 = vadd.f32 %v787_v13, %v287_v51 }
  0x40   : > { %vm990_vm8 = vmand %vm271_vm4, %vm329_vm3  ;;  %vm328_vm4 = vcmp.ge.f32.partialorder %v312_v47, 0.0  ;;  %v310_v9 = vadd.f32 %v787_v13, %v288_v53 }
  0x41   : > { %vm346_vm10 = vmand %vm272_vm6, %vm330_vm5 }
  0x42   : > { %vm496_vm13 = vmpackc.low %vm346_vm10, %vm990_vm8  ;;  %vm175_vm8 = vcmp.ge.f32.partialorder %v159_v44, 0.0  ;;  %vm120_vm10 = vcmp.ge.f32.partialorder %v104_v52, 1e-05 }
  0x43   : > { %523 = vmatprep.subr.msk.bf16.mxu0 %vm496_vm13, %v627_v6  ;;  %vm193_vm15 = vmand %vm121_vm7, %vm177_vm9  ;;  %vm119_vm7 = vcmp.ge.f32.partialorder %v103_v43, 1e-05 }
  0x44   : > { %524 = vmatpush3.bf16.msk.msra.mxu0 %vm496_vm13, %v627_v6  ;;  %vm194_vm1 = vmand %vm122_vm11, %vm178_vm12  ;;  %vm176_vm11 = vcmp.ge.f32.partialorder %v160_v46, 0.0  ;;  %vm251_vm13 = vcmp.ge.f32.partialorder %v235_v54, 1e-05 }
  0x45   : > { %vm269_vm3 = vmand %vm193_vm15, %vm253_vm14  ;;  %vm252_vm15 = vcmp.ge.f32.partialorder %v236_v55, 1e-05 }
  0x46   : > { %vm270_vm5 = vmand %vm194_vm1, %vm254_vm0  ;;  %vm325_vm1 = vcmp.ge.f32.partialorder %v309_v56, 0.0 }
  0x47   : > { %vm343_vm6 = vmand %vm269_vm3, %vm327_vm2  ;;  %vm326_vm3 = vcmp.ge.f32.partialorder %v310_v9, 0.0 }
  0x48   : > { %vm344_vm9 = vmand %vm270_vm5, %vm328_vm4 }
  0x49   : > { %vm498_vm12 = vmpackc.low %vm344_vm9, %vm343_vm6 }
  0x4a   : > { %525 = vmatprep.subr.msk.bf16.mxu0 %vm498_vm12, %v627_v6  ;;  %vm191_vm14 = vmand %vm119_vm7, %vm175_vm8 }
  0x4b   : > { %526 = vmatpush3.bf16.msk.msra.mxu0 %vm498_vm12, %v627_v6  ;;  %vm192_vm0 = vmand %vm120_vm10, %vm176_vm11 }
  0x4c   : > { %vm267_vm2 = vmand %vm191_vm14, %vm251_vm13 }
  0x4d   : > { %vm268_vm4 = vmand %vm192_vm0, %vm252_vm15 }
  0x4e   : > { %vm341_vm5 = vmand %vm267_vm2, %vm325_vm1 }
  0x4f   : > { %vm342_vm6 = vmand %vm268_vm4, %vm326_vm3 }
  0x50   : > { %vm500_vm9 = vmpackc.low %vm342_vm6, %vm341_vm5 }
  0x51   : > { %527 = vmatprep.subr.msk.bf16.mxu0 %vm500_vm9, %v627_v6 }
  0x52   : > { %528 = vmatpush3.bf16.msk.msra.mxu0 %vm500_vm9, %v627_v6  ;;  %v442_v6 = vld [vmem:[#allocation2] sm:$0xff] (%p58_p0) }
  0x55   : > { %530 = vmatmul.mubr.bf16.vlgmr.msra.gmra.mxu0 %v571_v48 }
 0x115   : > { %v531_v10 = vpop.f32.mrf.mxu0 }
 0x116   : > { %v441_v11 = vadd.f32 %v612_v36, %v531_v10  }
 0x117   : > { %v425_v13 = vpop.f32.mrf.mxu0 }
 0x118   : > { %v439_v57 = vadd.f32 %v620_v38, %v425_v13   ;;  %v1058_v36 = vmov %v441_v11  ;;  %v447_v0 = vadd.f32 (%p58_p0), %v444_v62, %v441_v11 }
 0x119   : > { %v532_v58 = vpop.f32.mrf.mxu0 }
 0x11a   : > { %v1060_v38 = vmov %v439_v57  ;;  %60 = sbr.rel (!%p58_p0) target bundleno = 12 (0xc), region = 40  ;;  %450 = vst [vmem:[#allocation2 + $0x10] sm:$0x3] (%p58_p0), %v447_v0 }
 0x11b   : > { %v428_v59 = vpop.f32.mrf.mxu0  ;;  %v445_v38 = vadd.f32 (%p58_p0), %v442_v6, %v439_v57 }
 0x11c   : > { %v440_v60 = vadd.f32 %v616_v37, %v428_v59  }
 0x11d   :  { %448 = vst [vmem:[#allocation2] sm:$0xff] (%p58_p0), %v445_v38 }
 0x11e   : > { %v1059_v37 = vmov %v440_v60  ;;  %v446_v63 = vadd.f32 (%p58_p0), %v443_v61, %v440_v60 }
 0x120   :  { %449 = vst [vmem:[#allocation2 + $0x8] sm:$0xff] %v446_v63 }
 0x121   :  { %583 = shalt.err (!%p580_p5)
}
 0x122   :  { %s629_s21 = smov 128   ;;  %s630_s1 = smov 8  }
 0x123   :  { %462 = dma.vmem_to_hbm [thread:$0]  %s457_s19, 384, %s1043_s2, [#allocation3], %s629_s21, %s629_s21, %s630_s1  }
 0x124   :  { %608 = dma.done.wait [#allocation3], 384  }
 0x125   :  { %609 = vsyncadd [#allocation3], 4294966912 }
 0x126   :  { %466 = vsyncpa [#allocation3], 1 }

</bundles_post_ra>
